<compile_context>
chip_gen: v6e
topology: v6e:2x2x1
jax: 0.10.0
libtpu: 0.0.40
codegen_flags: <defaults>
</compile_context>

<pallas_src>
import functools
import math

import jax
import jax.numpy as jnp
import numpy as np
from jax.experimental import pallas as pl
from jax.experimental.pallas import tpu as pltpu

_EPS = 1e-7            # numpy reference only (clip-form BCE)
_LANE = 128
_MIN_TN = 1024         # spatial tile must keep >= 8 sublane rows when tiling
_MAX_TN = 32768        # spatial cells per grid step (raised per perf review)
_VMEM_BUDGET = 6 << 20 # per-step input-block byte budget (x2 buffers << VMEM)


# ----------------------------- Pallas kernels --------------------------------
def _row_group_losses(pred_ref, tval_ref, wt_ref, *, include_cls):
    """Weighted elementwise losses per attribute row-group.

    pred_ref / tval_ref : (G, rows, TNS, 128) logits / targets
                          rows = [x, y, z, l, conf, (cls_0..)]
    wt_ref              : (G, 2,    TNS, 128) f32, rows = [mask, noobj]
    Returns a list of f32 tensors (G, k, TNS, 128) in row order
    [xyz, l, conf, (cls)].  Transcendentals are only issued on the rows that
    need them (row-pure tiles; no iota/where row selection).
    """
    w = wt_ref[...]                                  # always f32
    mask, noobj = w[:, 0:1], w[:, 1:2]               # broadcast over row axis

    # Rows 0..2: sigmoid (single EUP tanh) + MSE, masked.
    p_xyz = pred_ref[:, 0:3].astype(jnp.float32)
    t_xyz = tval_ref[:, 0:3].astype(jnp.float32)
    d = (0.5 * jnp.tanh(0.5 * p_xyz) + 0.5) - t_xyz
    groups = [d * d * mask]

    # Row 3: raw length, MSE, masked.
    p_l = pred_ref[:, 3:4].astype(jnp.float32)
    dl = p_l - tval_ref[:, 3:4].astype(jnp.float32)
    groups.append(dl * dl * mask)

    # Row 4: conf BCE from logits, fused weight mask + 0.015*noobj.
    p_c = pred_ref[:, 4:5].astype(jnp.float32)
    t_c = tval_ref[:, 4:5].astype(jnp.float32)
    bce_c = (jnp.maximum(p_c, 0.0) - p_c * t_c
             + jnp.log(1.0 + jnp.exp(-jnp.abs(p_c))))
    groups.append(bce_c * (mask + 0.015 * noobj))

    # Rows 5..: class BCE, selected by exact mask == 1.0 (mirrors the original
    # pred_cls[mask == 1]).  Only present when the host found such a cell.
    if include_cls:
        sel = (mask == 1.0).astype(jnp.float32)
        p_k = pred_ref[:, 5:].astype(jnp.float32)
        t_k = tval_ref[:, 5:].astype(jnp.float32)
        bce_k = (jnp.maximum(p_k, 0.0) - p_k * t_k
                 + jnp.log(1.0 + jnp.exp(-jnp.abs(p_k))))
        groups.append(bce_k * sel)
    return groups


def _yolo_loss_single_kernel(pred_ref, tval_ref, wt_ref, out_ref, *, include_cls):
    """Whole spatial extent in one block: reduce straight into the output."""
    groups = _row_group_losses(pred_ref, tval_ref, wt_ref, include_cls=include_cls)
    elem = jnp.concatenate([jnp.sum(grp, axis=0) for grp in groups], axis=0)
    v = jnp.sum(jnp.sum(elem, axis=-1), axis=-1)[:, None]        # (rows, 1)
    out_ref[0] = jnp.broadcast_to(v, (v.shape[0], out_ref.shape[-1]))


def _yolo_loss_multi_kernel(pred_ref, tval_ref, wt_ref, out_ref, acc_ref,
                            *, include_cls):
    """Spatially tiled variant: per-lane partials accumulate in f32 scratch;
    the single cross-lane reduction + store happen on the last spatial step."""
    j = pl.program_id(1)

    @pl.when(j == 0)
    def _():
        acc_ref[...] = jnp.zeros_like(acc_ref)

    groups = _row_group_losses(pred_ref, tval_ref, wt_ref, include_cls=include_cls)
    acc_ref[...] += jnp.concatenate([jnp.sum(grp, axis=0) for grp in groups], axis=0)

    @pl.when(j == pl.num_programs(1) - 1)
    def _():
        acc = acc_ref[...]
        v = jnp.sum(jnp.sum(acc, axis=-1), axis=-1)[:, None]     # (rows, 1)
        out_ref[0] = jnp.broadcast_to(v, (v.shape[0], out_ref.shape[-1]))


def _pick_group(ba, per_slab_bytes, budget):
    """Largest divisor of ba that fits the byte budget, preferring an even
    (and >= 2) outer grid so v7x megacore splits the work evenly."""
    cands = [g for g in range(1, ba + 1)
             if ba % g == 0 and g * per_slab_bytes <= budget]
    if not cands:
        cands = [1]
    even = [g for g in cands if (ba // g) >= 2 and (ba // g) % 2 == 0]
    multi = [g for g in cands if (ba // g) >= 2]
    pool = even or multi or cands
    return max(pool)


def yolo_loss_pallas(pred4, tval4, wts4, *, tns, include_cls,
                     vmem_budget=_VMEM_BUDGET):
    """pred4: (BA, attrs, SP128, 128); tval4: (BA, rows, SP128, 128);
    wts4: (BA, 2, SP128, 128) f32.  Returns (outer, rows) raw per-row sums."""
    ba, _, sp128, lane = pred4.shape
    rows = tval4.shape[1]
    steps = sp128 // tns
    per_slab = ((rows * pred4.dtype.itemsize + rows * tval4.dtype.itemsize
                 + 2 * 4) * tns * lane)
    g = _pick_group(ba, per_slab, vmem_budget)
    outer = ba // g

    blk_pt = (g, rows, tns, lane)       # pred block covers only rows 0..rows-1
    blk_w = (g, 2, tns, lane)
    out_blk = (1, rows, lane)

    if steps == 1:
        kernel = functools.partial(_yolo_loss_single_kernel,
                                   include_cls=include_cls)
        grid = (outer,)
        imap = lambda i: (i, 0, 0, 0)
        omap = lambda i: (i, 0, 0)
        scratch = []
        dims = ("parallel",)
    else:
        kernel = functools.partial(_yolo_loss_multi_kernel,
                                   include_cls=include_cls)
        grid = (outer, steps)
        imap = lambda i, j: (i, 0, j, 0)
        omap = lambda i, j: (i, 0, 0)
        scratch = [pltpu.VMEM((rows, tns, lane), jnp.float32)]
        dims = ("parallel", "arbitrary")

    out = pl.pallas_call(
        kernel,
        out_shape=jax.ShapeDtypeStruct((outer, rows, lane), jnp.float32),
        grid_spec=pltpu.PrefetchScalarGridSpec(
            num_scalar_prefetch=0,
            grid=grid,
            in_specs=[pl.BlockSpec(blk_pt, imap),
                      pl.BlockSpec(blk_pt, imap),
                      pl.BlockSpec(blk_w, imap)],
            out_specs=pl.BlockSpec(out_blk, omap),
            scratch_shapes=scratch),
        compiler_params=pltpu.CompilerParams(dimension_semantics=dims),
    )(pred4, tval4, wts4)
    return out[:, :, 0]                                    # (outer, rows)


# ------------------------------ module wrapper -------------------------------
class YOLOLoss3D:
    def __init__(self, anchors, num_classes, img_size, *, max_tn=_MAX_TN,
                 transport_dtype=jnp.float32, vmem_budget=_VMEM_BUDGET):
        self.anchors = anchors
        self.num_anchors = len(anchors)
        self.num_classes = num_classes
        self.bbox_attrs = 5 + num_classes
        self.feature_length = [img_size[0] // 16, img_size[0] // 8]
        self.img_size = img_size
        self.ignore_threshold = 0.5
        self.lambda_xyz = 1.0
        self.lambda_length = 1.0
        self.lambda_conf = 1.0
        self.lambda_cls = 1.0
        self.max_tn = max(_MIN_TN, (int(max_tn) // _MIN_TN) * _MIN_TN)
        self.transport_dtype = transport_dtype
        self.vmem_budget = vmem_budget

    def _scaled_anchors(self, in_w, in_h, in_d):
        sd = self.img_size[2] / in_d
        sh = self.img_size[1] / in_h
        sw = self.img_size[0] / in_w
        return [(aw / sw, ah / sh, ad / sd) for aw, ah, ad in self.anchors]

    # Host-side, data-dependent target assignment (mirrors the PyTorch loops).
    def get_target(self, targets, scaled_anchors, in_w, in_h, in_d):
        bs = len(targets)
        A = self.num_anchors // 2
        idx = self.feature_length.index(in_w)
        anchor_index = [[0, 1, 2], [3, 4, 5]][idx]
        sub = [0, 3][idx]
        shp = (bs, A, in_d, in_h, in_w)
        mask = np.zeros(shp, np.float32)
        noobj = np.ones(shp, np.float32)
        tx = np.zeros(shp, np.float32)
        ty = np.zeros(shp, np.float32)
        tz = np.zeros(shp, np.float32)
        tl = np.zeros(shp, np.float32)
        tconf = np.zeros(shp, np.float32)
        tcls = np.zeros(shp + (self.num_classes,), np.float32)
        anc = np.asarray(scaled_anchors, np.float32)              # (6, 3)
        for b in range(bs):
            for t in range(targets[b].shape[0]):
                gx = float(targets[b][t, 0]) * in_w
                gy = float(targets[b][t, 1]) * in_h
                gz = float(targets[b][t, 2]) * in_d
                gl = float(targets[b][t, 3]) * in_w
                gi, gj, gk = int(gx), int(gy), int(gz)
                gw = gh = gd = 2.0 * gl
                # TODO(synk): bbox_iou is undefined in the source module; use the
                # 3-D corner IoU consistent with jaccard() for (0,0,0,w,h,d) boxes.
                inter = (np.minimum(gw, anc[:, 0]) * np.minimum(gh, anc[:, 1])
                         * np.minimum(gd, anc[:, 2]))
                union = gw * gh * gd + anc[:, 0] * anc[:, 1] * anc[:, 2] - inter
                anch_ious = inter / union
                best_n = int(np.argmax(anch_ious))
                cur = anch_ious[sub:sub + 3]
                noobj[b, cur > 0.5, gk, gj, gi] = 0
                if best_n not in anchor_index:
                    continue
                if gj < in_h and gi < in_w and gk < in_d:
                    bn = best_n - sub
                    noobj[b, bn, gk, gj, gi] = 0
                    mask[b, bn, gk, gj, gi] = (gl / in_w * self.img_size[0] - 5) ** 2 / 5 + 1
                    tx[b, bn, gk, gj, gi] = gx - gi
                    ty[b, bn, gk, gj, gi] = gy - gj
                    tz[b, bn, gk, gj, gi] = gz - gk
                    tl[b, bn, gk, gj, gi] = math.log(
                        (gw + gh + gd) / 3.0 / scaled_anchors[best_n][0])
                    tconf[b, bn, gk, gj, gi] = 1
                    tcls[b, bn, gk, gj, gi, int(targets[b][t, 4])] = 1
        return mask, noobj, tx, ty, tz, tl, tconf, tcls

    def __call__(self, inp, targets):
        bs = int(inp.shape[0])
        in_d, in_h, in_w = (int(s) for s in inp.shape[2:5])
        A = self.num_anchors // 2
        attrs = self.bbox_attrs
        nc = self.num_classes
        S = in_d * in_h * in_w
        BA = bs * A
        scaled_anchors = self._scaled_anchors(in_w, in_h, in_d)

        m, no, tx, ty, tz, tl, tc, tcls = self.get_target(
            targets, scaled_anchors, in_w, in_h, in_d)
        self._cache = (m, no, tx, ty, tz, tl, tc, tcls)

        # pred_cls[mask == 1] in the original selects on exact float equality on
        # a mask holding ((gl/in_w*img-5)^2/5+1): the class term is nonzero only
        # if a cell hits exactly 1.0.  Detect on host; when empty, skip streaming
        # and computing the class rows entirely (exact semantics preserved).
        include_cls = bool(np.any(m == 1.0)) and nc > 0
        rows = 5 + (nc if include_cls else 0)

        # Spatial tiling: biggest block that fits the VMEM budget per step.
        t_isz = np.dtype(self.transport_dtype).itemsize
        per_elem = 2 * rows * t_isz + 2 * 4
        max_tn = min(self.max_tn,
                     max(_MIN_TN, (self.vmem_budget // per_elem)
                         // _MIN_TN * _MIN_TN))
        s128 = -(-S // _LANE) * _LANE
        if s128 <= max_tn:
            s_pad, tn = s128, s128
        else:
            tn = max_tn
            s_pad = -(-S // tn) * tn
        sp128 = s_pad // _LANE
        tns = tn // _LANE

        # Prediction slab: pure reshape of the conv output (no device transpose);
        # (bs, A*attrs, D, H, W) -> (BA, attrs, S) -> (BA, attrs, S/128, 128),
        # so each attribute row owns full (sublane, lane) tiles in-kernel.
        pred = inp.reshape(BA, attrs, S)
        if pred.dtype != np.dtype(self.transport_dtype):
            pred = pred.astype(self.transport_dtype)
        if s_pad != S:
            # TODO(synk): this zero-pad costs one extra HBM copy of pred; it only
            # triggers when D*H*W is not a multiple of 128 (padded cells carry
            # zero weights so they contribute exactly 0).
            pred = jnp.pad(pred, ((0, 0), (0, 0), (0, s_pad - S)))
        pred4 = pred.reshape(BA, attrs, sp128, _LANE)

        # Targets / weights built on the host directly in the kernel layout;
        # rows 0..3: tx,ty,tz,tl  row 4: tconf  rows 5..: tcls (only if needed).
        def flat(a):
            return a.reshape(bs, A, S)
        tval = np.zeros((bs, A, rows, s_pad), np.float32)
        for r, arr in enumerate((tx, ty, tz, tl, tc)):
            tval[:, :, r, :S] = flat(arr)
        if include_cls:
            tval[:, :, 5:, :S] = tcls.reshape(bs, A, S, nc).transpose(0, 1, 3, 2)
        wts = np.zeros((bs, A, 2, s_pad), np.float32)
        wts[:, :, 0, :S] = flat(m)
        wts[:, :, 1, :S] = flat(no)

        tval4 = tval.reshape(BA, rows, sp128, _LANE)
        if np.dtype(self.transport_dtype) != np.dtype(np.float32):
            tval4 = tval4.astype(self.transport_dtype)
        # wts stays f32: the mask weight carries the (..)^2/5+1 magnitude and the
        # exact ==1.0 selector; both must not be rounded (perf-review note).
        wts4 = wts.reshape(BA, 2, sp128, _LANE)

        raw = yolo_loss_pallas(pred4, jnp.asarray(tval4), jnp.asarray(wts4),
                               tns=tns, include_cls=include_cls,
                               vmem_budget=self.vmem_budget)      # (outer, rows)
        per_row = jnp.sum(raw, axis=0) / bs          # 1/bs + cross-slab sum on host
        loss_x, loss_y, loss_z = per_row[0], per_row[1], per_row[2]
        loss_l, loss_conf = per_row[3], per_row[4]
        loss_cls = jnp.sum(per_row[5:]) if include_cls else np.float32(0.0)
        loss = (self.lambda_xyz * (loss_x + loss_y + loss_z)
                + self.lambda_length * loss_l
                + self.lambda_conf * loss_conf
                + self.lambda_cls * loss_cls)
        return loss, (float(loss_x), float(loss_y), float(loss_z),
                      float(loss_l), float(loss_conf), float(loss_cls))

    # Pure-numpy reference of the forward (correctness check only).
    def reference(self, inp_np, round_dtype=None):
        bs, _, in_d, in_h, in_w = inp_np.shape
        A = self.num_anchors // 2
        attrs = self.bbox_attrs
        x = np.asarray(inp_np, np.float32)
        if round_dtype is not None:
            x = np.asarray(x.astype(round_dtype), np.float32)
        pred = x.reshape(bs, A, attrs, in_d, in_h, in_w).transpose(
            0, 1, 3, 4, 5, 2).astype(np.float64)
        sig = lambda v: 1.0 / (1.0 + np.exp(-v))
        px, py, pz = sig(pred[..., 0]), sig(pred[..., 1]), sig(pred[..., 2])
        pln = pred[..., 3]
        conf = sig(pred[..., 4])
        pcls = sig(pred[..., 5:])
        m, no, tx, ty, tz, tl, tc, tcls = (a.astype(np.float64) for a in self._cache)
        if round_dtype is not None:
            # Round exactly what the kernel transports in reduced precision
            # (mask/noobj stay f32 in the kernel as well).
            tx, ty, tz, tl, tc, tcls = (
                np.asarray(a.astype(round_dtype), np.float64)
                for a in (tx, ty, tz, tl, tc, tcls))

        def bce(p, t):
            p = np.clip(p, _EPS, 1.0 - _EPS)
            return -t * np.log(p) - (1.0 - t) * np.log(1.0 - p)

        lx = np.sum((px - tx) ** 2 / bs * m)
        ly = np.sum((py - ty) ** 2 / bs * m)
        lz = np.sum((pz - tz) ** 2 / bs * m)
        ll = np.sum((pln - tl) ** 2 / bs * m)
        bc = bce(conf, tc)
        lconf = np.sum(bc * m / bs) + np.sum(bc * no / bs) * 0.015
        selm = (m == 1.0)
        lcls = np.sum(bce(pcls[selm], tcls[selm]) / bs) if np.any(selm) else 0.0
        return ((lx + ly + lz) * self.lambda_xyz + ll * self.lambda_length
                + lconf * self.lambda_conf + lcls * self.lambda_cls)


# ---------------------------------- main -------------------------------------
if __name__ == "__main__":
    key = jax.random.PRNGKey(0)
    bs = 2
    num_classes = 2
    img_size = (128, 128, 128)
    anchors = [(16, 16, 16), (32, 32, 32), (48, 48, 48),
               (64, 64, 64), (96, 96, 96), (112, 112, 112)]
    A = len(anchors) // 2
    attrs = 5 + num_classes

    def make_targets(k, nt):
        k2, k3 = jax.random.split(k)
        coords = jax.random.uniform(k2, (bs, nt, 3), minval=0.05, maxval=0.95)
        lens = jax.random.uniform(k3, (bs, nt, 1), minval=0.05, maxval=0.30)
        cls = (jnp.arange(bs * nt).reshape(bs, nt, 1) % num_classes
               ).astype(jnp.float32)
        t = np.asarray(jnp.concatenate([coords, lens, cls], axis=-1), np.float32)
        return [t[b] for b in range(bs)]

    k_in1, k_in2, k_t1, k_t2 = jax.random.split(key, 4)

    # --- run 1: first scale (8^3), f32, class selector empty (common path) ----
    in_w1 = img_size[0] // 16
    inp1 = jax.random.normal(k_in1, (bs, A * attrs, in_w1, in_w1, in_w1),
                             jnp.float32)
    tgts1 = make_targets(k_t1, 3)
    loss_fn = YOLOLoss3D(anchors, num_classes, img_size)
    loss1, _ = loss_fn(inp1, tgts1)
    jax.block_until_ready(loss1)
    ref1 = loss_fn.reference(np.asarray(inp1))
    assert np.allclose(float(loss1), ref1, rtol=2e-3, atol=1e-3), (float(loss1), ref1)

    # --- run 2: one target hits mask == 1.0 exactly -> class-BCE path ---------
    tgts2 = [t.copy() for t in tgts1]
    special = np.array([[0.5, 0.5, 0.5, 5.0 / 128.0, 1.0]], np.float32)
    tgts2[0] = np.concatenate([tgts2[0], special], axis=0)
    loss2, _ = loss_fn(inp1, tgts2)
    jax.block_until_ready(loss2)
    ref2 = loss_fn.reference(np.asarray(inp1))
    assert np.allclose(float(loss2), ref2, rtol=2e-3, atol=1e-3), (float(loss2), ref2)

    # --- run 3: second scale (16^3), forced spatial tiling -> multi-step path -
    in_w2 = img_size[0] // 8
    inp2 = jax.random.normal(k_in2, (bs, A * attrs, in_w2, in_w2, in_w2),
                             jnp.float32)
    tgts3 = make_targets(k_t2, 3)
    loss_fn_tiled = YOLOLoss3D(anchors, num_classes, img_size, max_tn=1024)
    loss3, _ = loss_fn_tiled(inp2, tgts3)
    jax.block_until_ready(loss3)
    ref3 = loss_fn_tiled.reference(np.asarray(inp2))
    assert np.allclose(float(loss3), ref3, rtol=2e-3, atol=1e-3), (float(loss3), ref3)

    # --- run 4: bf16 transport of pred/targets (HBM-byte saver for v5e/v6e) ---
    loss_fn_bf16 = YOLOLoss3D(anchors, num_classes, img_size,
                              transport_dtype=jnp.bfloat16)
    loss4, _ = loss_fn_bf16(inp1, tgts1)
    jax.block_until_ready(loss4)
    ref4 = loss_fn_bf16.reference(np.asarray(inp1), round_dtype=jnp.bfloat16)
    assert np.allclose(float(loss4), ref4, rtol=5e-3, atol=5e-3), (float(loss4), ref4)

    print("KERNEL_OK")
</pallas_src>

<mosaic_0001>
module attributes {stable_mosaic.version = 11 : i64} {
  func.func @_yolo_loss_single_kernel(%arg0: i32, %arg1: memref<3x5x4x128xf32, #tpu.memory_space<vmem>>, %arg2: memref<3x5x4x128xf32, #tpu.memory_space<vmem>>, %arg3: memref<3x2x4x128xf32, #tpu.memory_space<vmem>>, %arg4: memref<1x5x128xf32, #tpu.memory_space<vmem>>) attributes {dimension_semantics = [#tpu.dimension_semantics<parallel>], iteration_bounds = array<i64: 2>, scalar_prefetch = 0 : i64, scratch_operands = 0 : i64, tpu.core_type = #tpu.core_type<tc>, window_params = [{transform_indices = @transform_0, window_bounds = array<i64: 3, 5, 4, 128>}, {transform_indices = @transform_1, window_bounds = array<i64: 3, 5, 4, 128>}, {transform_indices = @transform_2, window_bounds = array<i64: 3, 2, 4, 128>}, {transform_indices = @transform_3, window_bounds = array<i64: 1, 5, 128>}]} {
    %c0 = arith.constant 0 : index
    %c0_0 = arith.constant 0 : index
    %c0_1 = arith.constant 0 : index
    %c0_2 = arith.constant 0 : index
    %0 = vector.load %arg3[%c0, %c0_0, %c0_1, %c0_2] : memref<3x2x4x128xf32, #tpu.memory_space<vmem>>, vector<3x2x4x128xf32>
    %1 = vector.extract_strided_slice %0 {offsets = [0, 0, 0, 0], sizes = [3, 1, 4, 128], strides = [1, 1, 1, 1]} : vector<3x2x4x128xf32> to vector<3x1x4x128xf32>
    %2 = vector.extract_strided_slice %0 {offsets = [0, 1, 0, 0], sizes = [3, 1, 4, 128], strides = [1, 1, 1, 1]} : vector<3x2x4x128xf32> to vector<3x1x4x128xf32>
    %c0_3 = arith.constant 0 : index
    %c0_4 = arith.constant 0 : index
    %c0_5 = arith.constant 0 : index
    %c0_6 = arith.constant 0 : index
    %3 = vector.load %arg1[%c0_3, %c0_4, %c0_5, %c0_6] : memref<3x5x4x128xf32, #tpu.memory_space<vmem>>, vector<3x3x4x128xf32>
    %c0_7 = arith.constant 0 : index
    %c0_8 = arith.constant 0 : index
    %c0_9 = arith.constant 0 : index
    %c0_10 = arith.constant 0 : index
    %4 = vector.load %arg2[%c0_7, %c0_8, %c0_9, %c0_10] : memref<3x5x4x128xf32, #tpu.memory_space<vmem>>, vector<3x3x4x128xf32>
    %cst = arith.constant 5.000000e-01 : f32
    %5 = vector.broadcast %cst : f32 to vector<3x3x4x128xf32>
    %6 = arith.mulf %5, %3 : vector<3x3x4x128xf32>
    %7 = math.tanh %6 : vector<3x3x4x128xf32>
    %cst_11 = arith.constant 5.000000e-01 : f32
    %8 = vector.broadcast %cst_11 : f32 to vector<3x3x4x128xf32>
    %9 = arith.mulf %8, %7 : vector<3x3x4x128xf32>
    %cst_12 = arith.constant 5.000000e-01 : f32
    %10 = vector.broadcast %cst_12 : f32 to vector<3x3x4x128xf32>
    %11 = arith.addf %9, %10 : vector<3x3x4x128xf32>
    %12 = arith.subf %11, %4 : vector<3x3x4x128xf32>
    %13 = arith.mulf %12, %12 : vector<3x3x4x128xf32>
    %14 = vector.broadcast %1 : vector<3x1x4x128xf32> to vector<3x3x4x128xf32>
    %15 = arith.mulf %13, %14 : vector<3x3x4x128xf32>
    %c0_13 = arith.constant 0 : index
    %c3 = arith.constant 3 : index
    %c0_14 = arith.constant 0 : index
    %c0_15 = arith.constant 0 : index
    %16 = vector.load %arg1[%c0_13, %c3, %c0_14, %c0_15] : memref<3x5x4x128xf32, #tpu.memory_space<vmem>>, vector<3x1x4x128xf32>
    %c0_16 = arith.constant 0 : index
    %c3_17 = arith.constant 3 : index
    %c0_18 = arith.constant 0 : index
    %c0_19 = arith.constant 0 : index
    %17 = vector.load %arg2[%c0_16, %c3_17, %c0_18, %c0_19] : memref<3x5x4x128xf32, #tpu.memory_space<vmem>>, vector<3x1x4x128xf32>
    %18 = arith.subf %16, %17 : vector<3x1x4x128xf32>
    %19 = arith.mulf %18, %18 : vector<3x1x4x128xf32>
    %20 = arith.mulf %19, %1 : vector<3x1x4x128xf32>
    %c0_20 = arith.constant 0 : index
    %c4 = arith.constant 4 : index
    %c0_21 = arith.constant 0 : index
    %c0_22 = arith.constant 0 : index
    %21 = vector.load %arg1[%c0_20, %c4, %c0_21, %c0_22] : memref<3x5x4x128xf32, #tpu.memory_space<vmem>>, vector<3x1x4x128xf32>
    %c0_23 = arith.constant 0 : index
    %c4_24 = arith.constant 4 : index
    %c0_25 = arith.constant 0 : index
    %c0_26 = arith.constant 0 : index
    %22 = vector.load %arg2[%c0_23, %c4_24, %c0_25, %c0_26] : memref<3x5x4x128xf32, #tpu.memory_space<vmem>>, vector<3x1x4x128xf32>
    %cst_27 = arith.constant 0.000000e+00 : f32
    %23 = vector.broadcast %cst_27 : f32 to vector<3x1x4x128xf32>
    %24 = arith.maximumf %21, %23 : vector<3x1x4x128xf32>
    %25 = arith.mulf %21, %22 : vector<3x1x4x128xf32>
    %26 = arith.subf %24, %25 : vector<3x1x4x128xf32>
    %27 = math.absf %21 : vector<3x1x4x128xf32>
    %cst_28 = arith.constant 0.000000e+00 : f32
    %28 = vector.broadcast %cst_28 : f32 to vector<3x1x4x128xf32>
    %29 = arith.subf %28, %27 : vector<3x1x4x128xf32>
    %30 = math.exp %29 : vector<3x1x4x128xf32>
    %cst_29 = arith.constant 1.000000e+00 : f32
    %31 = vector.broadcast %cst_29 : f32 to vector<3x1x4x128xf32>
    %32 = arith.addf %31, %30 : vector<3x1x4x128xf32>
    %33 = math.log %32 : vector<3x1x4x128xf32>
    %34 = arith.addf %26, %33 : vector<3x1x4x128xf32>
    %cst_30 = arith.constant 1.500000e-02 : f32
    %35 = vector.broadcast %cst_30 : f32 to vector<3x1x4x128xf32>
    %36 = arith.mulf %35, %2 : vector<3x1x4x128xf32>
    %37 = arith.addf %1, %36 : vector<3x1x4x128xf32>
    %38 = arith.mulf %34, %37 : vector<3x1x4x128xf32>
    %cst_31 = arith.constant dense<0.000000e+00> : vector<3x4x128xf32>
    %39 = vector.multi_reduction <add>, %15, %cst_31 [0] : vector<3x3x4x128xf32> to vector<3x4x128xf32>
    %cst_32 = arith.constant dense<0.000000e+00> : vector<1x4x128xf32>
    %40 = vector.multi_reduction <add>, %20, %cst_32 [0] : vector<3x1x4x128xf32> to vector<1x4x128xf32>
    %cst_33 = arith.constant dense<0.000000e+00> : vector<1x4x128xf32>
    %41 = vector.multi_reduction <add>, %38, %cst_33 [0] : vector<3x1x4x128xf32> to vector<1x4x128xf32>
    %42 = tpu.concatenate %39, %40, %41 in 0 : vector<3x4x128xf32>, vector<1x4x128xf32>, vector<1x4x128xf32> -> vector<5x4x128xf32>
    %cst_34 = arith.constant dense<0.000000e+00> : vector<5x4xf32>
    %43 = vector.multi_reduction <add>, %42, %cst_34 [2] : vector<5x4x128xf32> to vector<5x4xf32>
    %cst_35 = arith.constant dense<0.000000e+00> : vector<5xf32>
    %44 = vector.multi_reduction <add>, %43, %cst_35 [1] : vector<5x4xf32> to vector<5xf32>
    %45 = vector.shape_cast %44 : vector<5xf32> to vector<5x1xf32>
    %46 = vector.shape_cast %45 : vector<5x1xf32> to vector<5x1xf32>
    %47 = vector.broadcast %46 : vector<5x1xf32> to vector<5x128xf32>
    %c0_36 = arith.constant 0 : index
    %c0_37 = arith.constant 0 : index
    %c0_38 = arith.constant 0 : index
    %48 = vector.load %arg4[%c0_36, %c0_37, %c0_38] : memref<1x5x128xf32, #tpu.memory_space<vmem>>, vector<1x5x128xf32>
    %49 = vector.shape_cast %48 : vector<1x5x128xf32> to vector<5x128xf32>
    %50 = vector.shape_cast %47 : vector<5x128xf32> to vector<1x5x128xf32>
    tpu.vector_store %arg4[%c0_36, %c0_37, %c0_38], %50 {strides = array<i32>} : memref<1x5x128xf32, #tpu.memory_space<vmem>>, vector<1x5x128xf32>,
    return
  }
  func.func @transform_0(%arg0: i32) -> (i32, i32, i32, i32) {
    %c0_i32 = arith.constant 0 : i32
    %c0_i32_0 = arith.constant 0 : i32
    %c0_i32_1 = arith.constant 0 : i32
    %c0_i32_2 = arith.constant 0 : i32
    return %arg0, %c0_i32, %c0_i32_0, %c0_i32_1 : i32, i32, i32, i32
  }
  func.func @transform_1(%arg0: i32) -> (i32, i32, i32, i32) {
    %c0_i32 = arith.constant 0 : i32
    %c0_i32_0 = arith.constant 0 : i32
    %c0_i32_1 = arith.constant 0 : i32
    %c0_i32_2 = arith.constant 0 : i32
    return %arg0, %c0_i32, %c0_i32_0, %c0_i32_1 : i32, i32, i32, i32
  }
  func.func @transform_2(%arg0: i32) -> (i32, i32, i32, i32) {
    %c0_i32 = arith.constant 0 : i32
    %c0_i32_0 = arith.constant 0 : i32
    %c0_i32_1 = arith.constant 0 : i32
    %c0_i32_2 = arith.constant 0 : i32
    return %arg0, %c0_i32, %c0_i32_0, %c0_i32_1 : i32, i32, i32, i32
  }
  func.func @transform_3(%arg0: i32) -> (i32, i32, i32) {
    %c0_i32 = arith.constant 0 : i32
    %c0_i32_0 = arith.constant 0 : i32
    %c0_i32_1 = arith.constant 0 : i32
    return %arg0, %c0_i32, %c0_i32_0 : i32, i32, i32
  }
}

</mosaic_0001>

<bundles_post_ra>
// kernel: tpu_custom_call.1
= control target key start
LH: loop header
LB: loop body
LE: loop exit
PB: predicated region body
PF: predicated region fallthrough
CT: control target
= control target key end

     0   :  { %8 = vsyncpa [#allocation3], 0  ;;  %s1155_s0 = inlined_call_operand.hbm [shape: f32[6,7,4,128], index: 0, kind: input, shape index: {}]   ;;  %s1156_s1 = inlined_call_operand.hbm [shape: f32[6,5,4,128], index: 1, kind: input, shape index: {}]   ;;  %s1157_s2 = inlined_call_operand.hbm [shape: f32[6,2,4,128], index: 2, kind: input, shape index: {}]   ;;  %s1158_s3 = inlined_call_operand.vmem [shape: f32[2,5,128], index: 3, kind: output, shape index: {}]  }
   0x1   :  { %10 = vsyncpa [#allocation3 + $0x1], 0 }
   0x2   :  { %11 = vsyncpa [#allocation5], 0 }
   0x3   :  { %13 = vsyncpa [#allocation5 + $0x1], 0  ;;  %s883_s12 = smov 0   ;;  %s885_s13 = smov 0  }
   0x4   :  { %s887_s14 = smov 0   ;;  %s889_s15 = smov 0  }
   0x5 LB: > { %s902_s16 = sadd.s32 4294967295, %s851_s15   ;;  %s905_s17 = sadd.s32 1, %s851_s15   ;;  %s851_s15 = sphi %s889_s15, %s1164_s15   ;;  %s847_s14 = sphi %s887_s14, %s1163_s14   ;;  %s843_s13 = sphi %s885_s13, %s1162_s13   ;;  %s839_s12 = sphi %s883_s12, %s1161_s12  }
   0x6   : > { %s23_s18 = ssub.s32 %s851_s15, %s905_s17  ;;  %s26_s19 = sadd.s32 1, %s847_s14 }
   0x7   : > { %p24_p0 = scmp.eq.s32.totalorder %s23_s18, 0  ;;  %p33_p1 = scmp.ne.s32.totalorder %s847_s14, %s843_s13 }
   0x8   : > { %p34_p2 = scmp.eq.s32.totalorder %s851_s15, 0  ;;  %p39_p3 = scmp.ne.s32.totalorder %s843_s13, %s839_s12 }
   0x9   : > { %s915_s20 = scalar_select %p24_p0, %s847_s14, %s26_s19  }
   0xa   : > { %p917_p4 = por %p34_p2, %p33_p1  ;;  %p40_p5 = scmp.eq.s32.totalorder %s902_s16, 0 }
   0xb   : > { %p643_p7 = scmp.ge.s32.totalorder %s851_s15, 2 }
   0xc   : > { %p922_p6 = por %p40_p5, %p39_p3 }
   0xd   : > { %137 = sbr.rel (%p643_p7) target bundleno = 80 (0x50), region = 16 }
  0x12   : > { %s928_s23 = sand.u32 1, %s847_s14   ;;  %s853_s25 = smov 448  }
  0x13   : > { %s669_s24 = smul.u32 60, %s928_s23  ;;  %677 = sst [smem:[#allocation8]] (%p917_p4), %s853_s25 }
  0x14   : > { %s689_s26 = smul.u32 1344, %s851_s15  ;;  %s854_s4 = smov 320  }
  0x15   : > { %s676_s27 = scalar_select %p917_p4, [#allocation0], [#allocation9] }
  0x16   : > { %s145_s28 = scalar_lea.vmem [#allocation2], %s669_s24  ;;  %678 = sst [smem:[#allocation8 + $0x1]] (%p917_p4), %s854_s4 }
  0x17   : > { %s165_s29 = sshll.u32 %s145_s28, 4  ;;  %s157_s30 = sld [smem:[%s676_s27]]   ;;  %s166_s29 = int_to_ptr.vmem [resolvable:$true] %s165_s29 }
  0x18   : > { %s855_s5 = smov 5   ;;  %s152_s8 = scalar_lea.hbm %s1155_s0, %s689_s26 }
  0x19   : > { %679 = sst [smem:[#allocation8 + $0x2]] (%p917_p4), %s855_s5  ;;  %s856_s9 = smov 64  }
  0x1a   : > { %680 = sst [smem:[#allocation8 + $0x3]] (%p917_p4), %s856_s9  ;;  %s857_s10 = smov 4  }
  0x1b   : > { %681 = sst [smem:[#allocation8 + $0x4]] (%p917_p4), %s856_s9  ;;  %s142_s18 = scalar_lea.sflag [#allocation3], %s928_s23 }
  0x1c   : > { %682 = sst [smem:[#allocation8 + $0x5]] (%p917_p4), %s857_s10  ;;  %s858_s19 = smov 131072  }
  0x1d   : > { %s645_s11 = sshll.u32 %s157_s30, 26  ;;  %s188_s25 = sand.u32 1, %s851_s15  }
  0x1e   : > { %s646_s12 = sadd.s32 134217728, %s645_s11  ;;  %s690_s26 = smul.u32 960, %s851_s15 }
  0x1f   : > { %683 = dma.general (%p917_p4), %s152_s8, 960, %s166_s29, %s142_s18, %s858_s19, [#allocation8], %s646_s12, 0  }
  0x20   : > { %s192_s27 = scalar_lea.vmem [#allocation4], %s669_s24  ;;  %s957_s6 = scalar_lea.hbm %s1156_s1, %s690_s26 }
  0x21   : > { %s200_s28 = sshll.u32 %s192_s27, 4  ;;  %s673_s30 = smul.u32 24, %s928_s23  ;;  %s959_s28 = int_to_ptr.vmem [resolvable:$true] %s200_s28 }
  0x22   : > { %s962_s29 = scalar_lea.sflag [#allocation5], %s188_s25  ;;  %s761_s7 = scalar_lea.hbm %s957_s6, 960 }
  0x23   : > { %p762_p8 = scmp.ne.s32.totalorder %s957_s6, %s761_s7  ;;  %s765_s9 = scalar_lea.hbm %s1156_s1, 1920 }
  0x24   : > { %p766_p11 = scmp.lt.s32.totalorder %s957_s6, %s1156_s1  ;;  %p767_p12 = scmp.lt.s32.totalorder %s765_s9, %s761_s7 }
  0x25   : > { %p763_p9 = pnand %p762_p8, %p917_p4 }
  0x26   : > { %p768_p13 = por %p767_p12, %p766_p11 }
  0x27   : > { %p764_p10 = pneg %p763_p9 }
  0x29   : > { %p769_p0 = pnand %p768_p13, %p764_p10 }
  0x2b   : > { %772 = shalt.err (!%p769_p0)
}
  0x2c   : > { %s773_s12 = scalar_lea.vmem %s959_s28, 960  ;;  %s859_s18 = smov [#allocation4]  }
  0x2d   : > { %p774_p1 = scmp.ne.s32.totalorder %s959_s28, %s773_s12  ;;  %s777_s19 = sshll.u32 %s859_s18, 4  ;;  %s778_s19 = int_to_ptr.vmem [resolvable:$false] %s777_s19 }
  0x2e   : > { %s779_s25 = scalar_lea.vmem %s778_s19, 1920  ;;  %p780_p5 = scmp.lt.s32.totalorder %s959_s28, %s778_s19 }
  0x2f   : > { %p775_p2 = pnand %p774_p1, %p917_p4  ;;  %p781_p7 = scmp.lt.s32.totalorder %s779_s25, %s773_s12 }
  0x31   : > { %p776_p3 = pneg %p775_p2  ;;  %p782_p8 = por %p781_p7, %p780_p5 }
  0x33   : > { %p783_p9 = pnand %p782_p8, %p776_p3 }
  0x35   : > { %786 = shalt.err (!%p783_p9)
}
  0x36   : > { %s860_s26 = smov 64   ;;  %s861_s27 = smov 4  }
  0x37   : > { %684 = dma.hbm_to_vmem [thread:$0]  (%p917_p4), %s957_s6, 960, %s959_s28, %s962_s29, %s860_s26, %s860_s26, %s861_s27  }
  0x38   : > { %s668_s4 = smul.u32 384, %s851_s15  ;;  %s214_s5 = scalar_lea.vmem [#allocation6], %s673_s30 }
  0x39   : > { %s222_s7 = sshll.u32 %s214_s5, 4  ;;  %s791_s23 = scalar_lea.hbm %s1157_s2, 768  ;;  %s223_s7 = int_to_ptr.vmem [resolvable:$true] %s222_s7 }
  0x3a   : > { %s994_s9 = scalar_lea.hbm %s1157_s2, %s668_s4 }
  0x3b   : > { %s787_s10 = scalar_lea.hbm %s994_s9, 384  ;;  %p792_p13 = scmp.lt.s32.totalorder %s994_s9, %s1157_s2 }
  0x3c   : > { %p788_p10 = scmp.ne.s32.totalorder %s994_s9, %s787_s10  ;;  %p793_p0 = scmp.lt.s32.totalorder %s791_s23, %s787_s10 }
  0x3e   : > { %p789_p11 = pnand %p788_p10, %p917_p4  ;;  %p794_p1 = por %p793_p0, %p792_p13 }
  0x40   : > { %p790_p12 = pneg %p789_p11 }
  0x42   : > { %p795_p2 = pnand %p794_p1, %p790_p12 }
  0x44   : > { %798 = shalt.err (!%p795_p2)
}
  0x45   : > { %s799_s12 = scalar_lea.vmem %s223_s7, 384  ;;  %s862_s18 = smov [#allocation6]  }
  0x46   : > { %p800_p3 = scmp.ne.s32.totalorder %s223_s7, %s799_s12  ;;  %s803_s19 = sshll.u32 %s862_s18, 4  ;;  %s804_s19 = int_to_ptr.vmem [resolvable:$false] %s803_s19 }
  0x47   : > { %s805_s25 = scalar_lea.vmem %s804_s19, 768  ;;  %p806_p8 = scmp.lt.s32.totalorder %s223_s7, %s804_s19 }
  0x48   : > { %p801_p5 = pnand %p800_p3, %p917_p4  ;;  %p807_p9 = scmp.lt.s32.totalorder %s805_s25, %s799_s12 }
  0x4a   : > { %p802_p7 = pneg %p801_p5  ;;  %p808_p10 = por %p807_p9, %p806_p8 }
  0x4c   : > { %p809_p11 = pnand %p808_p10, %p802_p7 }
  0x4e   : > { %812 = shalt.err (!%p809_p11)
}
  0x4f   : > { %685 = dma.hbm_to_vmem [thread:$0]  (%p917_p4), %s994_s9, 384, %s223_s7, %s962_s29, %s860_s26, %s860_s26, %s861_s27  }
  0x50 PF: > { %p650_p12 = scmp.ge.s32.totalorder %s851_s15, 1  ;;  %p230_p13 = scmp.lt.s32.totalorder %s851_s15, 3 }
  0x52   : > { %p231_p0 = pnand %p650_p12, %p230_p13 }
  0x53   : > { %s1019_s4 = sand.u32 (!%p231_p0), 1, %s843_s13  }
  0x54   : > { %234 = sbr.rel (%p231_p0) target bundleno = 437 (0x1b5), region = 32  ;;  %s237_s5 = scalar_lea.sflag (!%p231_p0), [#allocation3], %s1019_s4 }
  0x55   : > { %s674_s21 = smul.u32 (!%p231_p0), 60, %s1019_s4 }
  0x57   : > { %s1023_s24 = scalar_lea.vmem (!%p231_p0), [#allocation2], %s674_s21 }
  0x59   : > { %830 = dma.done.wait (%p922_p6), %s237_s5, 960  }
  0x5a   : > { %832 = vsyncadd (%p922_p6), %s237_s5, 4294966336  ;;  %s245_s15 = sand.u32 1, %s902_s16   ;;  %s1030_s26 = scalar_lea.vmem [#allocation4], %s674_s21 }
  0x5b   : > { %s246_s29 = scalar_lea.sflag [#allocation5], %s245_s15 }
  0x5c   : > { %834 = dma.done.wait (%p922_p6), %s246_s29, 1344  }
  0x5d   : > { %836 = vsyncadd (%p922_p6), %s246_s29, 4294965952  ;;  %v303_v0 = vld [vmem:[%s1023_s24] sm:$0xf]  ;;  %v306_v1 = vld [vmem:[%s1023_s24 + $0x14] sm:$0xf]  ;;  %s675_s22 = smul.u32 24, %s1019_s4 }
  0x5e   : > { %v309_v2 = vld [vmem:[%s1023_s24 + $0x28] sm:$0xf]  ;;  %v321_v3 = vmul.f32 0.5, %v303_v0  ;;  %v324_v4 = vmul.f32 0.5, %v306_v1  ;;  %v308_v7 = vld [vmem:[%s1023_s24 + $0x1c] sm:$0xf] }
  0x5f   : > { %v327_v5 = vmul.f32 0.5, %v309_v2  ;;  %v305_v6 = vld [vmem:[%s1023_s24 + $0x8] sm:$0xf]  ;;  %v311_v8 = vld [vmem:[%s1023_s24 + $0x30] sm:$0xf]  ;;  %v326_v10 = vmul.f32 0.5, %v308_v7 }
  0x60   : > { %731 = vtanh.f32 %v321_v3  ;;  %v323_v9 = vmul.f32 0.5, %v305_v6  ;;  %v329_v11 = vmul.f32 0.5, %v311_v8  ;;  %v304_v12 = vld [vmem:[%s1023_s24 + $0x4] sm:$0xf]  ;;  %v307_v13 = vld [vmem:[%s1023_s24 + $0x18] sm:$0xf] }
  0x61   : > { %733 = vtanh.f32 %v324_v4  ;;  %v310_v14 = vld [vmem:[%s1023_s24 + $0x2c] sm:$0xf]  ;;  %v322_v15 = vmul.f32 0.5, %v304_v12  ;;  %v325_v16 = vmul.f32 0.5, %v307_v13  ;;  %v653_v19 = vld [vmem:[%s1023_s24 + $0x20] sm:$0xf] }
  0x62   : > { %735 = vtanh.f32 %v327_v5  ;;  %v328_v17 = vmul.f32 0.5, %v310_v14  ;;  %v652_v18 = vld [vmem:[%s1023_s24 + $0xc] sm:$0xf]  ;;  %v654_v20 = vld [vmem:[%s1023_s24 + $0x34] sm:$0xf]  ;;  %s1058_s27 = scalar_lea.vmem [#allocation6], %s675_s22 }
  0x63   : > { %737 = vtanh.f32 %v323_v9  ;;  %v655_v21 = vld [vmem:[%s1030_s26 + $0xc] sm:$0xf]  ;;  %v656_v22 = vld [vmem:[%s1030_s26 + $0x20] sm:$0xf]  ;;  %v657_v23 = vld [vmem:[%s1030_s26 + $0x34] sm:$0xf] }
  0x64   : > { %739 = vtanh.f32 %v326_v10  ;;  %v392_v24 = vsub.f32 %v652_v18, %v655_v21  ;;  %v393_v25 = vsub.f32 %v653_v19, %v656_v22  ;;  %v394_v26 = vsub.f32 %v654_v20, %v657_v23  ;;  %v1053_v30 = vld [vmem:[%s1023_s24 + $0x10] sm:$0xf]  ;;  %v1056_v31 = vld [vmem:[%s1023_s24 + $0x24] sm:$0xf]  ;;  %v1064_v33 = vld [vmem:[%s1058_s27 + $0x8] sm:$0xf] }
  0x65   : > { %741 = vtanh.f32 %v329_v11  ;;  %v1061_v32 = vld [vmem:[%s1058_s27] sm:$0xf]  ;;  %v1069_v36 = vld [vmem:[%s1023_s24 + $0x38] sm:$0xf]  ;;  %v1072_v37 = vld [vmem:[%s1058_s27 + $0x10] sm:$0xf] }
  0x66   : > { %743 = vtanh.f32 %v322_v15  ;;  %v395_v27 = vmul.f32 %v392_v24, %v392_v24  ;;  %v396_v28 = vmul.f32 %v393_v25, %v393_v25  ;;  %v397_v29 = vmul.f32 %v394_v26, %v394_v26  ;;  %v312_v45 = vld [vmem:[%s1030_s26] sm:$0xf]  ;;  %v315_v51 = vld [vmem:[%s1030_s26 + $0x14] sm:$0xf]  ;;  %v318_v61 = vld [vmem:[%s1030_s26 + $0x28] sm:$0xf] }
  0x67   : > { %745 = vtanh.f32 %v325_v16  ;;  %v418_v38 = vand.u32 2147483647, %v1053_v30  ;;  %v419_v39 = vand.u32 2147483647, %v1056_v31  ;;  %vm451_vm0 = vcmask 1043456   ;;  %p293_p4 = scmp.lt.s32.totalorder %s902_s16, 1 }
  0x68   : > { %747 = vtanh.f32 %v328_v17  ;;  %v398_v34 = vmul.f32 %v395_v27, %v1061_v32  ;;  %v399_v35 = vmul.f32 %v396_v28, %v1064_v33  ;;  %v400_v40 = vmul.f32 %v397_v29, %v1072_v37  ;;  %v314_v4 = vld [vmem:[%s1030_s26 + $0x8] sm:$0xf]  ;;  %v317_v8 = vld [vmem:[%s1030_s26 + $0x1c] sm:$0xf]  ;;  %v320_v15 = vld [vmem:[%s1030_s26 + $0x30] sm:$0xf] }
  0x69   : > { %v420_v42 = vand.u32 2147483647, %v1069_v36  ;;  %v421_v43 = vsub.f32 0.0, %v418_v38  ;;  %v422_v49 = vsub.f32 0.0, %v419_v39  ;;  %vm519_vm1 = vcmask 1041409   ;;  %s1166_s16 = smov (!%p293_p4, %s902_s16), 1 }
  0x6a   : > { %v467_v47 = vsel %vm451_vm0, %v398_v34, 0.0  ;;  %v468_v48 = vsel %vm451_vm0, %v399_v35, 0.0  ;;  %v1083_v58 = vsel %vm451_vm0, %v400_v40, 0.0  ;;  %v313_v34 = vld [vmem:[%s1030_s26 + $0x4] sm:$0xf]  ;;  %vm521_vm2 = vcmask 1042434  }
  0x6b   : > { %v423_v53 = vsub.f32 0.0, %v420_v42  ;;  %v424_v54 = vmul.f32 1.442695, %v421_v43  ;;  %v426_v59 = vmul.f32 1.442695, %v422_v49  ;;  %v1086_v0 = vadd.f32 %v468_v48, %v467_v47  ;;  %s651_s7 = sshll.u32 %s1166_s16, 3 }
  0x6c   : > { %v319_v42 = vld [vmem:[%s1030_s26 + $0x2c] sm:$0xf]  ;;  %vm523_vm3 = vcmask 1043459   ;;  %vm525_vm4 = vcmask 1044484   ;;  %vm528_vm5 = vcmask 28672   ;;  %s296_s10 = scalar_lea.vmem %s1158_s3, %s651_s7 }
  0x6d   : > { %v732_v41 = vpop.eup %731  ;;  %749 = vpow2.f32 %v424_v54  ;;  %v428_v11 = vmul.f32 1.442695, %v423_v53 }
  0x6e   : > { %v734_v44 = vpop.eup %733  ;;  %v339_v46 = vmul.f32 0.5, %v732_v41  ;;  %751 = vpow2.f32 %v426_v59  ;;  %v316_v41 = vld [vmem:[%s1030_s26 + $0x18] sm:$0xf] }
  0x6f   : > { %v736_v50 = vpop.eup %735  ;;  %v342_v52 = vmul.f32 0.5, %v734_v44  ;;  %753 = vpow2.f32 %v428_v11 }
  0x70   : > { %v738_v55 = vpop.eup %737  ;;  %v345_v56 = vmul.f32 0.5, %v736_v50  ;;  %v348_v57 = vadd.f32 0.5, %v339_v46 }
  0x71   : > { %v740_v60 = vpop.eup %739  ;;  %v351_v62 = vadd.f32 0.5, %v342_v52  ;;  %v341_v63 = vmul.f32 0.5, %v738_v55 }
  0x72   : > { %v742_v1 = vpop.eup %741  ;;  %v354_v2 = vadd.f32 0.5, %v345_v56  ;;  %v357_v3 = vsub.f32 %v348_v57, %v312_v45  ;;  %v344_v5 = vmul.f32 0.5, %v740_v60 }
  0x73   : > { %v744_v6 = vpop.eup %743  ;;  %v360_v7 = vsub.f32 %v351_v62, %v315_v51  ;;  %v347_v9 = vmul.f32 0.5, %v742_v1  ;;  %v350_v10 = vadd.f32 0.5, %v341_v63 }
  0x74   : > { %v746_v12 = vpop.eup %745  ;;  %v363_v13 = vsub.f32 %v354_v2, %v318_v61  ;;  %v366_v14 = vmul.f32 %v357_v3, %v357_v3  ;;  %v353_v16 = vadd.f32 0.5, %v344_v5  ;;  %v340_v17 = vmul.f32 0.5, %v744_v6 }
  0x75   : > { %v748_v18 = vpop.eup %747  ;;  %v369_v19 = vmul.f32 %v360_v7, %v360_v7  ;;  %v356_v20 = vadd.f32 0.5, %v347_v9  ;;  %v359_v21 = vsub.f32 %v350_v10, %v314_v4  ;;  %v343_v22 = vmul.f32 0.5, %v746_v12 }
  0x76   : > { %v372_v23 = vmul.f32 %v363_v13, %v363_v13  ;;  %v375_v24 = vmul.f32 %v366_v14, %v1061_v32  ;;  %v362_v25 = vsub.f32 %v353_v16, %v317_v8  ;;  %v346_v26 = vmul.f32 0.5, %v748_v18  ;;  %v662_v18 = vld [vmem:[%s1030_s26 + $0x24] sm:$0xf] }
  0x77   : > { %v378_v27 = vmul.f32 %v369_v19, %v1064_v33  ;;  %v365_v28 = vsub.f32 %v356_v20, %v320_v15  ;;  %v368_v29 = vmul.f32 %v359_v21, %v359_v21  ;;  %v349_v35 = vadd.f32 0.5, %v340_v17  ;;  %v661_v17 = vld [vmem:[%s1030_s26 + $0x10] sm:$0xf] }
  0x78   : > { %v381_v38 = vmul.f32 %v372_v23, %v1072_v37  ;;  %v452_v39 = vsel %vm451_vm0, %v375_v24, 0.0  ;;  %v371_v40 = vmul.f32 %v362_v25, %v362_v25  ;;  %v352_v43 = vadd.f32 0.5, %v343_v22  ;;  %v298_v25 = vld [vmem:[%s1058_s27 + $0x4] sm:$0xf] }
  0x79   : > { %v453_v44 = vsel %vm451_vm0, %v378_v27, 0.0  ;;  %v374_v45 = vmul.f32 %v365_v28, %v365_v28  ;;  %v377_v46 = vmul.f32 %v368_v29, %v1061_v32  ;;  %v355_v47 = vadd.f32 0.5, %v346_v26  ;;  %v300_v26 = vld [vmem:[%s1058_s27 + $0xc] sm:$0xf] }
  0x7a   : > { %v454_v48 = vadd.f32 %v453_v44, %v452_v39  ;;  %v455_v49 = vsel %vm451_vm0, %v381_v38, 0.0  ;;  %v380_v50 = vmul.f32 %v371_v40, %v1064_v33  ;;  %v358_v51 = vsub.f32 %v349_v35, %v313_v34  ;;  %v750_v1 = vpop.eup %749  ;;  %v302_v44 = vld [vmem:[%s1058_s27 + $0x14] sm:$0xf] }
  0x7b   : > { %v383_v52 = vmul.f32 %v374_v45, %v1072_v37  ;;  %v462_v53 = vsel %vm451_vm0, %v377_v46, 0.0  ;;  %v361_v54 = vsub.f32 %v352_v43, %v316_v41  ;;  %v364_v55 = vsub.f32 %v355_v47, %v319_v42  ;;  %v752_v5 = vpop.eup %751  ;;  %v663_v41 = vld [vmem:[%s1030_s26 + $0x38] sm:$0xf] }
  0x7c   : > { %v456_v56 = vadd.f32 %v455_v49, %v454_v48  ;;  %v463_v57 = vsel %vm451_vm0, %v380_v50, 0.0  ;;  %v367_v59 = vmul.f32 %v358_v51, %v358_v51  ;;  %v471_v4 = vadd.f32 %v1083_v58, %v1086_v0  ;;  %v754_v19 = vpop.eup %753 }
  0x7d   : > { %v464_v60 = vadd.f32 %v463_v57, %v462_v53  ;;  %v465_v61 = vsel %vm451_vm0, %v383_v52, 0.0  ;;  %v370_v62 = vmul.f32 %v361_v54, %v361_v54  ;;  %v373_v63 = vmul.f32 %v364_v55, %v364_v55 }
  0x7e   : > { %v477_v2 = vsel %vm451_vm0, %v456_v56, 0.0  ;;  %v376_v3 = vmul.f32 %v367_v59, %v1061_v32  ;;  %v430_v9 = vadd.f32 1.0, %v750_v1  ;;  %v431_v11 = vadd.f32 1.0, %v752_v5 }
  0x7f   : > { %478 = vadd.xlane.f32.xlu0 %v477_v2  ;;  %v466_v6 = vadd.f32 %v465_v61, %v464_v60  ;;  %v379_v7 = vmul.f32 %v370_v62, %v1064_v33  ;;  %v382_v8 = vmul.f32 %v373_v63, %v1072_v37  ;;  %v486_v0 = vsel %vm451_vm0, %v471_v4, 0.0 }
  0x80   : > { %v457_v10 = vsel %vm451_vm0, %v376_v3, 0.0  ;;  %755 = vlog2.f32 %v430_v9  ;;  %v409_v20 = vmax.f32 %v1053_v30, 0.0  ;;  %v410_v21 = vmax.f32 %v1056_v31, 0.0 }
  0x81   : > { %v483_v12 = vsel %vm451_vm0, %v466_v6, 0.0  ;;  %v458_v13 = vsel %vm451_vm0, %v379_v7, 0.0  ;;  %v460_v14 = vsel %vm451_vm0, %v382_v8, 0.0  ;;  %757 = vlog2.f32 %v431_v11 }
  0x82   : > { %484 = vadd.xlane.f32.xlu1 %v483_v12  ;;  %v459_v58 = vadd.f32 %v458_v13, %v457_v10  ;;  %v412_v22 = vmul.f32 %v661_v17, %v1053_v30  ;;  %v413_v23 = vmul.f32 %v662_v18, %v1056_v31  ;;  %v432_v24 = vadd.f32 1.0, %v754_v19 }
  0x83   : > { %v442_v34 = vmul.f32 0.015, %v298_v25  ;;  %v443_v35 = vmul.f32 0.015, %v300_v26  ;;  %v411_v45 = vmax.f32 %v1069_v36, 0.0  ;;  %v414_v46 = vmul.f32 %v663_v41, %v1069_v36 }
  0x84   : > { %v461_v15 = vadd.f32 %v460_v14, %v459_v58  ;;  %759 = vlog2.f32 %v432_v24  ;;  %v415_v28 = vsub.f32 %v409_v20, %v412_v22  ;;  %v416_v29 = vsub.f32 %v410_v21, %v413_v23 }
  0x85   : > { %v445_v30 = vadd.f32 %v442_v34, %v1061_v32  ;;  %v446_v31 = vadd.f32 %v443_v35, %v1064_v33  ;;  %v444_v47 = vmul.f32 0.015, %v302_v44  ;;  %v417_v50 = vsub.f32 %v411_v45, %v414_v46 }
  0x86   : > { %v480_v16 = vsel %vm451_vm0, %v461_v15, 0.0  ;;  %487 = vadd.xlane.f32.xlu1 %v486_v0  ;;  %v497_v60 = vlaneseq }
  0x87   : > { %481 = vadd.xlane.f32.xlu0 %v480_v16  ;;  %v447_v53 = vadd.f32 %v444_v47, %v1072_v37 }
  0x88   : > { %v498_v62 = vand.u32 127, %v497_v60  ;;  %v500_v63 = vshrl.u32 %v497_v60, 7 }
  0x8a   : > { %v501_v1 = vsub.s32 %v498_v62, %v500_v63 }
  0x8d   : > { %v756_v27 = vpop.eup %755 }
  0x8e   : > { %v758_v38 = vpop.eup %757  ;;  %v434_v39 = vmul.f32 0.6931472, %v756_v27 }
  0x8f   : > { %v436_v40 = vmul.f32 0.6931472, %v758_v38 }
  0x90   : > { %v439_v42 = vadd.f32 %v434_v39, %v415_v28 }
  0x91   : > { %v440_v43 = vadd.f32 %v436_v40, %v416_v29  ;;  %v760_v51 = vpop.eup %759 }
  0x92   : > { %v448_v48 = vmul.f32 %v445_v30, %v439_v42  ;;  %v438_v52 = vmul.f32 0.6931472, %v760_v51 }
  0x93   : > { %v449_v49 = vmul.f32 %v446_v31, %v440_v43 }
  0x94   : > { %v472_v54 = vsel %vm451_vm0, %v448_v48, 0.0  ;;  %v441_v32 = vadd.f32 %v438_v52, %v417_v50 }
  0x95   : > { %v473_v55 = vsel %vm451_vm0, %v449_v49, 0.0 }
  0x96   : > { %v474_v56 = vadd.f32 %v473_v55, %v472_v54  ;;  %v450_v33 = vmul.f32 %v447_v53, %v441_v32 }
  0x98   : > { %v475_v57 = vsel %vm451_vm0, %v450_v33, 0.0 }
  0x99   : > { %v476_v59 = vadd.f32 %v475_v57, %v474_v56 }
  0x9b   : > { %v489_v36 = vsel %vm451_vm0, %v476_v59, 0.0 }
  0x9c   : > { %490 = vadd.xlane.f32.xlu0 %v489_v36 }
 0x108   : > { %v479_v61 = vpop.xlane.xlu0 %478 }
 0x109   : > { %v502_v3 = vrot.slane %v479_v61, %v501_v1 }
 0x10b   : > { %v485_v2 = vpop.xlane.xlu1 %484 }
 0x10c   : > { %v510_v5 = vrot.slane %v485_v2, %v501_v1 }
 0x10f   : > { %v488_v6 = vpop.xlane.xlu1 %487 }
 0x110   : > { %v482_v37 = vpop.xlane.xlu0 %481  ;;  %v514_v8 = vrot.slane %v488_v6, %v501_v1 }
 0x111   : > { %v506_v4 = vrot.slane %v482_v37, %v501_v1 }
 0x113   : > { %v520_v7 = vsel %vm519_vm1, %v506_v4, %v502_v3 }
 0x114   : > { %v522_v9 = vsel %vm521_vm2, %v510_v5, %v520_v7 }
 0x115   : > { %v524_v12 = vsel %vm523_vm3, %v514_v8, %v522_v9 }
 0x125   : > { %v491_v10 = vpop.xlane.xlu0 %490 }
 0x126   : > { %v518_v11 = vrot.slane %v491_v10, %v501_v1 }
 0x128   : > { %v526_v13 = vsel %vm525_vm4, %v518_v11, %v524_v12 }
 0x129   : > { %v529_v14 = vsel %vm528_vm5, %v526_v13, 0.0 }
 0x12a   : > { %530 = vadd.xlane.f32.xlu1 %v529_v14 }
 0x1b3   : > { %v531_v58 = vpop.xlane.xlu1 %530 }
 0x1b4   : > { %532 = vst [vmem:[%s296_s10] sm:$0x1f] %v531_v58 }
 0x1b5 PF: > { %p16_p6 = scmp.ge.s32.totalorder %s905_s17, 4   ;;  %s1161_s12 = smov %s843_s13 }
 0x1b6   : > { %s1162_s13 = smov %s847_s14  ;;  %s1163_s14 = smov %s915_s20 }
 0x1b7   : > { %s1164_s15 = smov %s905_s17  ;;  %18 = sbr.rel (!%p16_p6) target bundleno = 5 (0x5), region = 105 }
 0x1bc   :  { %552 = vsyncpa [#allocation3], 1 }
 0x1bd   :  { %554 = vsyncpa [#allocation3 + $0x1], 1 }
 0x1be   :  { %555 = vsyncpa [#allocation5], 1 }
 0x1bf   :  { %557 = vsyncpa [#allocation5 + $0x1], 1 }

</bundles_post_ra>
